<compile_context>
chip_gen: v7x
topology: tpu7x:2x2x1
jax: 0.10.0
libtpu: 0.0.40
codegen_flags: <defaults>
</compile_context>

<pallas_src>
import jax
import jax.numpy as jnp
from jax.experimental import pallas as pl
from jax.experimental.pallas import tpu as pltpu


def _round_up(x, m):
    return ((x + m - 1) // m) * m


def _logreg_kernel(x_ref, w_ref, o_ref):
    # x_ref: (TM, D)   w_ref: (1, D) f32   o_ref: (1, 1, TM) f32 (lane-dense row)
    x = x_ref[...].astype(jnp.float32)
    prod = x * w_ref[...]                       # VPU; weight broadcast over sublanes
    logits = jnp.sum(prod, axis=-1)             # XLU lane reduction -> (TM,)
    logits = logits.reshape(o_ref.shape)        # relayout to lane-dense (1, 1, TM)
    o_ref[...] = jax.nn.sigmoid(logits).astype(o_ref.dtype)   # EUP


def _target_block_bytes():
    # ~1/8 of physical VMEM per x buffer: 8 MiB on v7x (64 MiB VMEM),
    # 16 MiB on v5e/v6e (128 MiB VMEM).  Double-buffered -> 16-32 MiB, well
    # inside the explicit vmem_limit_bytes requested below.
    try:
        vmem = pltpu.get_tpu_info().vmem_capacity_bytes
    except Exception:
        vmem = 64 * 1024 * 1024
    return int(min(16 * 1024 * 1024, max(8 * 1024 * 1024, vmem // 8)))


def _pick_block_rows(batch, input_dim, itemsize, *, min_grid_steps=4):
    # VMEM blocks are (8,128)-tiled: a (tm, D) block really occupies
    # tm * round_up(D, 128) * itemsize bytes -- account for the lane padding.
    bytes_per_row = _round_up(max(input_dim, 1), 128) * itemsize
    tm = _target_block_bytes() // bytes_per_row
    # Don't make the tile larger than the batch, and keep >= min_grid_steps grid
    # steps so DMA double-buffering actually overlaps and both v7x TCs get work.
    tm = min(tm, _round_up(batch, 8))
    if batch > min_grid_steps * 8:
        tm = min(tm, _round_up(pl.cdiv(batch, min_grid_steps), 8))
    return max(8, (tm // 8) * 8)


def logistic_regression_forward(x, weight, *, block_rows=None):
    """sigmoid(x @ weight.T); x:(B, D), weight:(1, D) (nn.Linear layout) -> (B, 1) f32."""
    B, D = x.shape
    assert weight.shape == (1, D), weight.shape

    if not jnp.issubdtype(x.dtype, jnp.floating):
        x = x.astype(jnp.float32)        # bf16 x is fine too (f32 accumulation in-kernel)
    weight = weight.astype(jnp.float32)
    itemsize = x.dtype.itemsize

    tm = _pick_block_rows(B, D, itemsize) if block_rows is None else int(block_rows)
    assert tm > 0 and tm % 8 == 0, tm
    num_tiles = pl.cdiv(B, tm)           # last tile may be partial -> masked, no jnp.pad

    # Explicit scoped-VMEM budget: 2x x block + 2x (lane-dense) out block +
    # resident weight + headroom, capped at 48 MiB so the plan ports to v7x (64 MiB).
    x_block = tm * _round_up(D, 128) * itemsize
    o_block = 8 * _round_up(tm, 128) * 4
    w_block = 8 * _round_up(D, 128) * 4
    vmem_limit = min(max(2 * x_block + 2 * o_block + 2 * w_block + (4 << 20), 32 << 20),
                     48 << 20)

    out_tiles = pl.pallas_call(
        _logreg_kernel,
        out_shape=jax.ShapeDtypeStruct((num_tiles, 1, tm), jnp.float32),
        grid_spec=pl.GridSpec(
            grid=(num_tiles,),
            in_specs=[
                # x: one (tm, D) batch tile per step (double-buffered DMA); D == full dim.
                pl.BlockSpec((tm, D), lambda i: (i, 0)),
                # weight: full (1, D) row, VMEM-resident across the whole grid.
                pl.BlockSpec((1, D), lambda i: (0, 0)),
            ],
            # Lane-dense output: block trailing dims == full array trailing dims (1, tm).
            out_specs=pl.BlockSpec((1, 1, tm), lambda i: (i, 0, 0)),
        ),
        compiler_params=pltpu.CompilerParams(
            dimension_semantics=("parallel",),   # shard the batch loop across v7x's 2 TCs
            vmem_limit_bytes=int(vmem_limit),
        ),
        cost_estimate=pl.CostEstimate(
            flops=2 * B * D,
            transcendentals=B,
            bytes_accessed=B * D * itemsize + D * 4 + B * 4,
        ),
    )(x, weight)

    # Rows of the last (partial) tile beyond B are garbage and are dropped here;
    # never reduce over the tiled output before this slice.
    return out_tiles.reshape(num_tiles * tm, 1)[:B]
    # TODO(synk): for extremely large input_dim (one x row >> VMEM) add a feature-axis
    # grid with a pl.when-guarded f32 accumulator; not needed at these sizes.


if __name__ == "__main__":
    key = jax.random.PRNGKey(0)
    kx, kw = jax.random.split(key)

    # Batch deliberately NOT a multiple of the tile so the padded-free
    # partial-last-tile path is exercised.
    batch, input_dim = 500, 64
    x = jax.random.normal(kx, (batch, input_dim), dtype=jnp.float32)
    # PyTorch nn.Linear(input_dim, 1, bias=False) weight layout: (1, input_dim).
    bound = 1.0 / (input_dim ** 0.5)
    weight = jax.random.uniform(kw, (1, input_dim), dtype=jnp.float32,
                                minval=-bound, maxval=bound)

    ref = jax.nn.sigmoid(x @ weight.T)

    # Auto tiling: tm=128 -> grid=(4,), last tile partial (116 valid rows);
    # multi-step, software-pipelined grid with no host-side padding.
    out = jax.block_until_ready(logistic_regression_forward(x, weight))
    assert out.shape == (batch, 1)
    assert jnp.allclose(out, ref, atol=1e-5, rtol=1e-5)

    # A second explicit tile size (2 steps, different partial tail) as a sanity check.
    out2 = jax.block_until_ready(logistic_regression_forward(x, weight, block_rows=256))
    assert jnp.allclose(out2, ref, atol=1e-5, rtol=1e-5)

    print("KERNEL_OK")
</pallas_src>

<mosaic_0001>
module attributes {stable_mosaic.version = 11 : i64} {
  func.func @_logreg_kernel(%arg0: i32, %arg1: memref<128x64xf32, #tpu.memory_space<vmem>>, %arg2: memref<1x64xf32, #tpu.memory_space<vmem>>, %arg3: memref<1x1x128xf32, #tpu.memory_space<vmem>>) attributes {dimension_semantics = [#tpu.dimension_semantics<parallel>], iteration_bounds = array<i64: 4>, scalar_prefetch = 0 : i64, scratch_operands = 0 : i64, tpu.core_type = #tpu.core_type<tc>, window_params = [{transform_indices = @transform_0, window_bounds = array<i64: 128, 64>}, {pipeline_mode = #tpu.pipeline_mode<synchronous>, transform_indices = @transform_1, window_bounds = array<i64: 1, 64>}, {transform_indices = @transform_2, window_bounds = array<i64: 1, 1, 128>}]} {
    %c0 = arith.constant 0 : index
    %c0_0 = arith.constant 0 : index
    %0 = vector.load %arg1[%c0, %c0_0] : memref<128x64xf32, #tpu.memory_space<vmem>>, vector<128x64xf32>
    %c0_1 = arith.constant 0 : index
    %c0_2 = arith.constant 0 : index
    %1 = vector.load %arg2[%c0_1, %c0_2] : memref<1x64xf32, #tpu.memory_space<vmem>>, vector<1x64xf32>
    %2 = vector.broadcast %1 : vector<1x64xf32> to vector<128x64xf32>
    %3 = arith.mulf %0, %2 : vector<128x64xf32>
    %cst = arith.constant dense<0.000000e+00> : vector<128xf32>
    %4 = vector.multi_reduction <add>, %3, %cst [1] : vector<128x64xf32> to vector<128xf32>
    %5 = vector.shape_cast %4 : vector<128xf32> to vector<1x1x128xf32>
    %6 = arith.negf %5 : vector<1x1x128xf32>
    %7 = math.exp %6 : vector<1x1x128xf32>
    %cst_3 = arith.constant 1.000000e+00 : f32
    %8 = vector.broadcast %cst_3 : f32 to vector<1x1x128xf32>
    %9 = arith.addf %8, %7 : vector<1x1x128xf32>
    %10 = arith.divf %8, %9 : vector<1x1x128xf32>
    %c0_4 = arith.constant 0 : index
    %c0_5 = arith.constant 0 : index
    %c0_6 = arith.constant 0 : index
    %11 = vector.load %arg3[%c0_4, %c0_5, %c0_6] : memref<1x1x128xf32, #tpu.memory_space<vmem>>, vector<1x1x128xf32>
    tpu.vector_store %arg3[%c0_4, %c0_5, %c0_6], %10 {strides = array<i32>} : memref<1x1x128xf32, #tpu.memory_space<vmem>>, vector<1x1x128xf32>,
    return
  }
  func.func @transform_0(%arg0: i32) -> (i32, i32) {
    %c0_i32 = arith.constant 0 : i32
    %c0_i32_0 = arith.constant 0 : i32
    return %arg0, %c0_i32 : i32, i32
  }
  func.func @transform_1(%arg0: i32) -> (i32, i32) {
    %c0_i32 = arith.constant 0 : i32
    %c0_i32_0 = arith.constant 0 : i32
    %c0_i32_1 = arith.constant 0 : i32
    return %c0_i32, %c0_i32_0 : i32, i32
  }
  func.func @transform_2(%arg0: i32) -> (i32, i32, i32) {
    %c0_i32 = arith.constant 0 : i32
    %c0_i32_0 = arith.constant 0 : i32
    %c0_i32_1 = arith.constant 0 : i32
    return %arg0, %c0_i32, %c0_i32_0 : i32, i32, i32
  }
}

</mosaic_0001>

<bundles_post_ra>
// kernel: tpu_custom_call.1
= control target key start
LH: loop header
LB: loop body
LE: loop exit
PB: predicated region body
PF: predicated region fallthrough
CT: control target
= control target key end

     0   :  { %7 = vsyncpa [#allocation3], 0  ;;  %s931_s0 = inlined_call_operand.vmem [shape: f32[500,64], index: 0, kind: input, shape index: {}]   ;;  %s932_s1 = inlined_call_operand.vmem [shape: f32[1,64], index: 1, kind: input, shape index: {}]   ;;  %s933_s2 = inlined_call_operand.hbm [shape: f32[4,1,128], index: 2, kind: output, shape index: {}]  }
   0x1   :  { %9 = vsyncpa [#allocation3 + $0x1], 0  ;;  %s753_s9 = smov 0   ;;  %s755_s10 = smov 0  }
   0x2   :  { %s757_s11 = smov 0   ;;  %s759_s12 = smov 0  }
   0x3 LB: > { %s543_s13 = sadd.s32 4294967295, %s735_s12   ;;  %s544_s14 = sadd.s32 4294967294, %s735_s12   ;;  %s735_s12 = sphi %s759_s12, %s939_s12   ;;  %s731_s11 = sphi %s757_s11, %s938_s11   ;;  %s727_s10 = sphi %s755_s10, %s937_s10   ;;  %s723_s9 = sphi %s753_s9, %s936_s9  }
   0x4   : > { %s776_s15 = sadd.s32 1, %s735_s12   ;;  %s69_s16 = sadd.s32 1, %s731_s11 }
   0x5   : > { %s66_s17 = ssub.s32 %s735_s12, %s776_s15  ;;  %p79_p0 = scmp.ne.s32.totalorder %s731_s11, %s727_s10 }
   0x6   : > { %p67_p1 = scmp.eq.s32.totalorder %s66_s17, 0  ;;  %p80_p2 = scmp.eq.s32.totalorder %s543_s13, 3 }
   0x7   : > { %p85_p3 = scmp.ne.s32.totalorder %s727_s10, %s723_s9  ;;  %p86_p4 = scmp.eq.s32.totalorder %s544_s14, 3 }
   0x8   : > { %s786_s18 = scalar_select %p67_p1, %s731_s11, %s69_s16  }
   0x9   : > { %p788_p5 = por %p80_p2, %p79_p0  ;;  %p792_p6 = por %p86_p4, %p85_p3 }
   0xa   : > { %p547_p7 = scmp.ge.s32.totalorder %s735_s12, 1  ;;  %p124_p8 = scmp.lt.s32.totalorder %s735_s12, 5 }
   0xc   : > { %p125_p9 = pnand %p547_p7, %p124_p8 }
   0xd   : > { %s798_s21 = sshll.u32 (!%p125_p9), %s543_s13, 4  ;;  %v550_v0 = vld [vmem:[%s932_s1] ss:$0 sm:$0xff] (!%p125_p9)  ;;  %vm202_vm0 = vcmask (!%p125_p9), 523264   ;;  %vm374_vm1 = vcmask (!%p125_p9), 130112   ;;  %vm381_vm2 = vcmask (!%p125_p9), 195712  }
   0xe   : > { %128 = sbr.rel (%p125_p9) target bundleno = 245 (0xf5), region = 28  ;;  %p154_p10 = scmp.lt.s32.totalorder (!%p125_p9), %s798_s21, 62  ;;  %vm388_vm3 = vcmask (!%p125_p9), 261312   ;;  %vm395_vm4 = vcmask (!%p125_p9), 326912   ;;  %vm402_vm5 = vcmask (!%p125_p9), 392512   ;;  %vm409_vm6 = vcmask (!%p125_p9), 458112  }
   0xf   : > { %vm416_vm7 = vcmask (!%p125_p9), 523712   ;;  %vm423_vm8 = vcmask (!%p125_p9), 589312   ;;  %vm430_vm9 = vcmask (!%p125_p9), 654912   ;;  %vm437_vm10 = vcmask (!%p125_p9), 720512   ;;  %s147_s29 = sand.u32 (!%p125_p9), 1, %s727_s10   ;;  %s889_s6 = scalar_lea.hbm (!%p125_p9), %s933_s2, %s798_s21 }
  0x10   : > { %vm444_vm11 = vcmask (!%p125_p9), 786112   ;;  %vm451_vm12 = vcmask (!%p125_p9), 851712   ;;  %vm458_vm13 = vcmask (!%p125_p9), 917312   ;;  %vm465_vm14 = vcmask (!%p125_p9), 982912   ;;  %s148_s30 = scalar_lea.vmem (!%p125_p9), [#allocation2], %s147_s29  ;;  %s477_s7 = scalar_lea.sflag (!%p125_p9), [#allocation3], %s147_s29 }
  0x11   : > { %s489_s3 = sshll.u32 (!%p125_p9), %s148_s30, 4  ;;  %vm472_vm15 = vcmask (!%p125_p9), 1048512   ;;  %s737_s13 = smov (!%p125_p9), [#allocation2]   ;;  %s891_s3 = int_to_ptr.vmem [resolvable:$true] %s489_s3 }
  0x12   : > { %s673_s8 = scalar_lea.vmem (!%p125_p9), %s891_s3, 16  ;;  %s677_s14 = sshll.u32 (!%p125_p9), %s737_s13, 4  ;;  %s678_s14 = int_to_ptr.vmem [resolvable:$false] %s677_s14 }
  0x13   : > { %p674_p11 = scmp.ne.s32.totalorder (!%p125_p9), %s891_s3, %s673_s8  ;;  %s679_s16 = scalar_lea.vmem (!%p125_p9), %s678_s14, 32 }
  0x14   : > { %p680_p0 = scmp.lt.s32.totalorder (!%p125_p9), %s891_s3, %s678_s14  ;;  %p681_p1 = scmp.lt.s32.totalorder (!%p125_p9), %s679_s16, %s673_s8 }
  0x15   : > { %s155_s22 = scalar_select %p154_p10, %s798_s21, 62 }
  0x16   : > { %p675_p12 = pnand %p674_p11, %p788_p5  ;;  %p682_p2 = por %p681_p1, %p680_p0 }
  0x17   : > { %s549_s23 = sshll.u32 %s155_s22, 3 }
  0x18   : > { %s808_s28 = scalar_lea.vmem %s931_s0, %s549_s23  ;;  %p676_p13 = pneg %p675_p12 }
  0x19   : > { %v163_v1 = vld [vmem:[%s808_s28] sm:$0xff]  ;;  %v165_v2 = vld [vmem:[%s808_s28 + $0x10] sm:$0xff]  ;;  %v164_v3 = vld [vmem:[%s808_s28 + $0x8] sm:$0xff] }
  0x1a   : > { %v186_v4 = vmul.f32 %v550_v0, %v163_v1  ;;  %v188_v5 = vmul.f32 %v550_v0, %v165_v2  ;;  %v187_v6 = vmul.f32 %v550_v0, %v164_v3  ;;  %v166_v7 = vld [vmem:[%s808_s28 + $0x18] sm:$0xff]  ;;  %v167_v9 = vld [vmem:[%s808_s28 + $0x20] sm:$0xff]  ;;  %v168_v10 = vld [vmem:[%s808_s28 + $0x28] sm:$0xff]  ;;  %p683_p3 = pnand %p682_p2, %p676_p13 }
  0x1b   : > { %v189_v8 = vmul.f32 %v550_v0, %v166_v7  ;;  %v190_v15 = vmul.f32 %v550_v0, %v167_v9  ;;  %v191_v16 = vmul.f32 %v550_v0, %v168_v10  ;;  %v169_v17 = vld [vmem:[%s808_s28 + $0x30] sm:$0xff]  ;;  %v170_v18 = vld [vmem:[%s808_s28 + $0x38] sm:$0xff]  ;;  %v171_v23 = vld [vmem:[%s808_s28 + $0x40] sm:$0xff] }
  0x1c   : > { %v203_v11 = vsel %vm202_vm0, %v186_v4, 0.0  ;;  %v209_v12 = vsel %vm202_vm0, %v188_v5, 0.0  ;;  %v206_v13 = vsel %vm202_vm0, %v187_v6, 0.0  ;;  %v192_v21 = vmul.f32 %v550_v0, %v169_v17  ;;  %v172_v24 = vld [vmem:[%s808_s28 + $0x48] sm:$0xff]  ;;  %v173_v29 = vld [vmem:[%s808_s28 + $0x50] sm:$0xff]  ;;  %v174_v30 = vld [vmem:[%s808_s28 + $0x58] sm:$0xff] }
  0x1d   : > { %204 = vadd.xlane.f32.xlu0 %v203_v11  ;;  %210 = vadd.xlane.f32.xlu1 %v209_v12  ;;  %v212_v14 = vsel %vm202_vm0, %v189_v8, 0.0  ;;  %v215_v19 = vsel %vm202_vm0, %v190_v15, 0.0  ;;  %v218_v20 = vsel %vm202_vm0, %v191_v16, 0.0  ;;  %v193_v22 = vmul.f32 %v550_v0, %v170_v18  ;;  %v175_v35 = vld [vmem:[%s808_s28 + $0x60] sm:$0xff]  ;;  %v176_v36 = vld [vmem:[%s808_s28 + $0x68] sm:$0xff]  ;;  %v177_v41 = vld [vmem:[%s808_s28 + $0x70] sm:$0xff] }
  0x1e   : > { %v221_v25 = vsel %vm202_vm0, %v192_v21, 0.0  ;;  %v194_v27 = vmul.f32 %v550_v0, %v171_v23  ;;  %v195_v28 = vmul.f32 %v550_v0, %v172_v24  ;;  %v196_v33 = vmul.f32 %v550_v0, %v173_v29  ;;  %v178_v42 = vld [vmem:[%s808_s28 + $0x78] sm:$0xff] }
  0x1f   : > { %v224_v26 = vsel %vm202_vm0, %v193_v22, 0.0  ;;  %v197_v34 = vmul.f32 %v550_v0, %v174_v30  ;;  %v198_v39 = vmul.f32 %v550_v0, %v175_v35  ;;  %v199_v40 = vmul.f32 %v550_v0, %v176_v36 }
  0x20   : > { %v227_v31 = vsel %vm202_vm0, %v194_v27, 0.0  ;;  %v230_v32 = vsel %vm202_vm0, %v195_v28, 0.0  ;;  %v233_v37 = vsel %vm202_vm0, %v196_v33, 0.0  ;;  %v200_v45 = vmul.f32 %v550_v0, %v177_v41 }
  0x21   : > { %207 = vadd.xlane.f32.xlu0 %v206_v13  ;;  %213 = vadd.xlane.f32.xlu1 %v212_v14  ;;  %v236_v38 = vsel %vm202_vm0, %v197_v34, 0.0  ;;  %v239_v43 = vsel %vm202_vm0, %v198_v39, 0.0  ;;  %v242_v44 = vsel %vm202_vm0, %v199_v40, 0.0  ;;  %v201_v46 = vmul.f32 %v550_v0, %v178_v42 }
  0x22   : > { %v245_v47 = vsel %vm202_vm0, %v200_v45, 0.0  ;;  %v363_v4 = vlaneseq }
  0x23   : > { %v248_v48 = vsel %vm202_vm0, %v201_v46, 0.0 }
  0x24   : > { %v842_v13 = vand.u32 127, %v363_v4 }
  0x25   : > { %216 = vadd.xlane.f32.xlu0 %v215_v19  ;;  %219 = vadd.xlane.f32.xlu1 %v218_v20  ;;  %v844_v20 = vshrl.u32 %v363_v4, 7 }
  0x26   : > { %v376_v23 = vadd.s32 4294967280, %v842_v13  ;;  %v369_v24 = vadd.s32 4294967288, %v842_v13  ;;  %v390_v33 = vadd.s32 4294967264, %v842_v13  ;;  %v397_v41 = vadd.s32 4294967256, %v842_v13 }
  0x27   : > { %v367_v36 = vsub.s32 %v842_v13, %v844_v20 }
  0x29   : > { %222 = vadd.xlane.f32.xlu0 %v221_v25  ;;  %225 = vadd.xlane.f32.xlu1 %v224_v26  ;;  %v383_v26 = vadd.s32 4294967272, %v842_v13 }
  0x2b   : > { %v386_v40 = vsub.s32 %v383_v26, %v844_v20 }
  0x2d   : > { %228 = vadd.xlane.f32.xlu0 %v227_v31  ;;  %231 = vadd.xlane.f32.xlu1 %v230_v32 }
  0x31   : > { %234 = vadd.xlane.f32.xlu0 %v233_v37  ;;  %237 = vadd.xlane.f32.xlu1 %v236_v38  ;;  %v379_v37 = vsub.s32 %v376_v23, %v844_v20  ;;  %v372_v38 = vsub.s32 %v369_v24, %v844_v20  ;;  %v439_v24 = vadd.s32 4294967208, %v842_v13 }
  0x35   : > { %240 = vadd.xlane.f32.xlu0 %v239_v43  ;;  %243 = vadd.xlane.f32.xlu1 %v242_v44 }
  0x39   : > { %246 = vadd.xlane.f32.xlu0 %v245_v47  ;;  %249 = vadd.xlane.f32.xlu1 %v248_v48  ;;  %v393_v48 = vsub.s32 %v390_v33, %v844_v20  ;;  %v446_v33 = vadd.s32 4294967200, %v842_v13 }
  0xaa   : > { %v205_v49 = vpop.xlane.xlu0 %204  ;;  %v211_v50 = vpop.xlane.xlu1 %210 }
  0xab   : > { %v551_v51 = vmul.f32 -1.442695, %v205_v49  ;;  %v553_v52 = vmul.f32 -1.442695, %v211_v50 }
  0xad   : > { %609 = vpow2.f32 %v551_v51 }
  0xae   : > { %611 = vpow2.f32 %v553_v52  ;;  %v208_v53 = vpop.xlane.xlu0 %207  ;;  %v214_v54 = vpop.xlane.xlu1 %213 }
  0xaf   : > { %v552_v55 = vmul.f32 -1.442695, %v208_v53  ;;  %v554_v56 = vmul.f32 -1.442695, %v214_v54  ;;  %v404_v54 = vadd.s32 4294967248, %v842_v13 }
  0xb1   : > { %613 = vpow2.f32 %v552_v55 }
  0xb2   : > { %615 = vpow2.f32 %v554_v56  ;;  %v217_v57 = vpop.xlane.xlu0 %216  ;;  %v220_v58 = vpop.xlane.xlu1 %219 }
  0xb3   : > { %v555_v59 = vmul.f32 -1.442695, %v217_v57  ;;  %v556_v60 = vmul.f32 -1.442695, %v220_v58  ;;  %v400_v58 = vsub.s32 %v397_v41, %v844_v20 }
  0xb5   : > { %617 = vpow2.f32 %v555_v59 }
  0xb6   : > { %619 = vpow2.f32 %v556_v60  ;;  %v223_v61 = vpop.xlane.xlu0 %222  ;;  %v226_v62 = vpop.xlane.xlu1 %225 }
  0xb7   : > { %v610_v63 = vpop.eup %609  ;;  %v557_v0 = vmul.f32 -1.442695, %v223_v61  ;;  %v558_v3 = vmul.f32 -1.442695, %v226_v62  ;;  %v411_v61 = vadd.s32 4294967240, %v842_v13 }
  0xb8   : > { %v612_v1 = vpop.eup %611  ;;  %v299_v2 = vadd.f32 1.0, %v610_v63 }
  0xb9   : > { %v301_v5 = vadd.f32 1.0, %v612_v1  ;;  %621 = vpow2.f32 %v557_v0  ;;  %v418_v1 = vadd.s32 4294967232, %v842_v13 }
  0xba   : > { %623 = vrcp.f32 %v299_v2  ;;  %v229_v6 = vpop.xlane.xlu0 %228  ;;  %v232_v7 = vpop.xlane.xlu1 %231 }
  0xbb   : > { %v614_v8 = vpop.eup %613  ;;  %625 = vrcp.f32 %v301_v5  ;;  %v559_v9 = vmul.f32 -1.442695, %v229_v6  ;;  %v560_v12 = vmul.f32 -1.442695, %v232_v7  ;;  %v407_v5 = vsub.s32 %v404_v54, %v844_v20 }
  0xbc   : > { %v616_v10 = vpop.eup %615  ;;  %v300_v11 = vadd.f32 1.0, %v614_v8  ;;  %627 = vpow2.f32 %v558_v3 }
  0xbd   : > { %v302_v14 = vadd.f32 1.0, %v616_v10  ;;  %629 = vpow2.f32 %v559_v9  ;;  %v414_v9 = vsub.s32 %v411_v61, %v844_v20 }
  0xbe   : > { %631 = vrcp.f32 %v300_v11  ;;  %v235_v15 = vpop.xlane.xlu0 %234  ;;  %v238_v16 = vpop.xlane.xlu1 %237 }
  0xbf   : > { %v618_v17 = vpop.eup %617  ;;  %633 = vrcp.f32 %v302_v14  ;;  %v561_v18 = vmul.f32 -1.442695, %v235_v15  ;;  %v562_v22 = vmul.f32 -1.442695, %v238_v16  ;;  %v421_v14 = vsub.s32 %v418_v1, %v844_v20 }
  0xc0   : > { %v620_v19 = vpop.eup %619  ;;  %v303_v21 = vadd.f32 1.0, %v618_v17  ;;  %635 = vpow2.f32 %v560_v12  ;;  %v425_v15 = vadd.s32 4294967224, %v842_v13 }
  0xc1   : > { %v304_v25 = vadd.f32 1.0, %v620_v19  ;;  %637 = vpow2.f32 %v561_v18 }
  0xc2   : > { %639 = vrcp.f32 %v303_v21  ;;  %v241_v27 = vpop.xlane.xlu0 %240  ;;  %v244_v28 = vpop.xlane.xlu1 %243  ;;  %v432_v21 = vadd.s32 4294967216, %v842_v13 }
  0xc3   : > { %v622_v29 = vpop.eup %621  ;;  %641 = vrcp.f32 %v304_v25  ;;  %v563_v30 = vmul.f32 -1.442695, %v241_v27  ;;  %v564_v31 = vmul.f32 -1.442695, %v244_v28  ;;  %v428_v28 = vsub.s32 %v425_v15, %v844_v20 }
  0xc4   : > { %v624_v32 = vpop.eup %623  ;;  %v305_v34 = vadd.f32 1.0, %v622_v29  ;;  %643 = vpow2.f32 %v562_v22 }
  0xc5   : > { %v626_v35 = vpop.eup %625  ;;  %645 = vpow2.f32 %v563_v30  ;;  %v368_v52 = vrot.slane %v624_v32, %v367_v36  ;;  %v435_v32 = vsub.s32 %v432_v21, %v844_v20 }
  0xc6   : > { %v628_v39 = vpop.eup %627  ;;  %647 = vrcp.f32 %v305_v34  ;;  %v247_v42 = vpop.xlane.xlu0 %246  ;;  %v380_v56 = vrot.slane %v626_v35, %v379_v37  ;;  %v442_v37 = vsub.s32 %v439_v24, %v844_v20 }
  0xc7   : > { %v250_v43 = vpop.xlane.xlu1 %249  ;;  %v630_v44 = vpop.eup %629  ;;  %v306_v45 = vadd.f32 1.0, %v628_v39  ;;  %649 = vpow2.f32 %v564_v31  ;;  %v565_v46 = vmul.f32 -1.442695, %v247_v42  ;;  %v453_v42 = vadd.s32 4294967192, %v842_v13 }
  0xc8   : > { %v632_v47 = vpop.eup %631  ;;  %v307_v49 = vadd.f32 1.0, %v630_v44  ;;  %v566_v50 = vmul.f32 -1.442695, %v250_v43 }
  0xc9   : > { %v634_v51 = vpop.eup %633  ;;  %v373_v53 = vrot.slane %v632_v47, %v372_v38  ;;  %651 = vrcp.f32 %v306_v45  ;;  %v449_v45 = vsub.s32 %v446_v33, %v844_v20  ;;  %v460_v47 = vadd.s32 4294967184, %v842_v13 }
  0xca   : > { %v636_v55 = vpop.eup %635  ;;  %v387_v57 = vrot.slane %v634_v51, %v386_v40  ;;  %653 = vrcp.f32 %v307_v49  ;;  %v456_v51 = vsub.s32 %v453_v42, %v844_v20 }
  0xcb   : > { %v638_v59 = vpop.eup %637  ;;  %v375_v60 = vsel %vm374_vm1, %v373_v53, %v368_v52  ;;  %v308_v62 = vadd.f32 1.0, %v636_v55  ;;  %655 = vpow2.f32 %v565_v46  ;;  %v467_v52 = vadd.s32 4294967176, %v842_v13 }
  0xcc   : > { %v640_v63 = vpop.eup %639  ;;  %v382_v0 = vsel %vm381_vm2, %v380_v56, %v375_v60  ;;  %v309_v2 = vadd.f32 1.0, %v638_v59  ;;  %657 = vpow2.f32 %v566_v50  ;;  %v463_v56 = vsub.s32 %v460_v47, %v844_v20 }
  0xcd   : > { %v642_v3 = vpop.eup %641  ;;  %v394_v4 = vrot.slane %v640_v63, %v393_v48  ;;  %659 = vrcp.f32 %v308_v62  ;;  %v389_v7 = vsel %vm388_vm3, %v387_v57, %v382_v0  ;;  %v470_v59 = vsub.s32 %v467_v52, %v844_v20 }
  0xce   : > { %v644_v6 = vpop.eup %643  ;;  %661 = vrcp.f32 %v309_v2  ;;  %v401_v12 = vrot.slane %v642_v3, %v400_v58 }
  0xcf   : > { %v646_v8 = vpop.eup %645  ;;  %v310_v10 = vadd.f32 1.0, %v644_v6  ;;  %v396_v18 = vsel %vm395_vm4, %v394_v4, %v389_v7 }
  0xd0   : > { %v648_v11 = vpop.eup %647  ;;  %v311_v16 = vadd.f32 1.0, %v646_v8  ;;  %v403_v26 = vsel %vm402_vm5, %v401_v12, %v396_v18 }
  0xd1   : > { %v650_v17 = vpop.eup %649  ;;  %v408_v19 = vrot.slane %v648_v11, %v407_v5  ;;  %663 = vrcp.f32 %v310_v10 }
  0xd2   : > { %665 = vrcp.f32 %v311_v16  ;;  %v312_v22 = vadd.f32 1.0, %v650_v17 }
  0xd3   : > { %v652_v23 = vpop.eup %651  ;;  %v410_v30 = vsel %vm409_vm6, %v408_v19, %v403_v26 }
  0xd4   : > { %v654_v25 = vpop.eup %653  ;;  %v415_v27 = vrot.slane %v652_v23, %v414_v9  ;;  %667 = vrcp.f32 %v312_v22 }
  0xd5   : > { %v656_v29 = vpop.eup %655  ;;  %v422_v31 = vrot.slane %v654_v25, %v421_v14 }
  0xd6   : > { %v658_v34 = vpop.eup %657  ;;  %v313_v35 = vadd.f32 1.0, %v656_v29  ;;  %v417_v40 = vsel %vm416_vm7, %v415_v27, %v410_v30 }
  0xd7   : > { %v660_v36 = vpop.eup %659  ;;  %v314_v38 = vadd.f32 1.0, %v658_v34  ;;  %v424_v43 = vsel %vm423_vm8, %v422_v31, %v417_v40 }
  0xd8   : > { %v662_v39 = vpop.eup %661  ;;  %v429_v41 = vrot.slane %v660_v36, %v428_v28  ;;  %669 = vrcp.f32 %v313_v35 }
  0xd9   : > { %v436_v44 = vrot.slane %v662_v39, %v435_v32  ;;  %671 = vrcp.f32 %v314_v38 }
  0xda   : > { %v431_v50 = vsel %vm430_vm9, %v429_v41, %v424_v43 }
  0xdb   : > { %v664_v46 = vpop.eup %663  ;;  %v438_v54 = vsel %vm437_vm10, %v436_v44, %v431_v50 }
  0xdc   : > { %v666_v48 = vpop.eup %665  ;;  %v443_v49 = vrot.slane %v664_v46, %v442_v37 }
  0xdd   : > { %v450_v53 = vrot.slane %v666_v48, %v449_v45 }
  0xde   : > { %v668_v55 = vpop.eup %667  ;;  %v445_v57 = vsel %vm444_vm11, %v443_v49, %v438_v54 }
  0xdf   : > { %v457_v58 = vrot.slane %v668_v55, %v456_v51  ;;  %v452_v60 = vsel %vm451_vm12, %v450_v53, %v445_v57 }
  0xe1   : > { %v459_v63 = vsel %vm458_vm13, %v457_v58, %v452_v60 }
  0xe2   : > { %v670_v61 = vpop.eup %669 }
  0xe3   : > { %v672_v13 = vpop.eup %671  ;;  %v464_v62 = vrot.slane %v670_v61, %v463_v56 }
  0xe4   : > { %v471_v0 = vrot.slane %v672_v13, %v470_v59 }
  0xe5   : > { %v466_v1 = vsel %vm465_vm14, %v464_v62, %v459_v63 }
  0xe6   : > { %v473_v20 = vsel %vm472_vm15, %v471_v0, %v466_v1 }
  0xe7   : > { %475 = vst [vmem:[%s148_s30] sm:$0x1] %v473_v20 }
  0xe8   : > { %686 = shalt.err (!%p683_p3)
}
  0xe9   : > { %s687_s17 = scalar_lea.hbm %s889_s6, 16  ;;  %s691_s23 = scalar_lea.hbm %s933_s2, 64 }
  0xea   : > { %p688_p4 = scmp.ne.s32.totalorder %s889_s6, %s687_s17  ;;  %p692_p9 = scmp.lt.u32.totalorder %s889_s6, %s933_s2 }
  0xeb   : > { %p693_p10 = scmp.lt.u32.totalorder %s691_s23, %s687_s17  ;;  %p695_p12 = scmp.lt.u32.totalorder %s687_s17, %s889_s6 }
  0xec   : > { %p689_p7 = pnand %p688_p4, %p788_p5 }
  0xed   : > { %p694_p11 = por %p693_p10, %p692_p9 }
  0xee   : > { %p690_p8 = pneg %p689_p7 }
  0xef   : > { %p696_p13 = por %p695_p12, %p694_p11 }
  0xf1   : > { %p697_p0 = pnand %p696_p13, %p690_p8 }
  0xf3   : > { %700 = shalt.err (!%p697_p0)
}
  0xf4   : > { %570 = dma.vmem_to_hbm [thread:$0]  (%p788_p5), %s891_s3, 16, %s889_s6, %s477_s7  }
  0xf5 PF: > { %p576_p1 = scmp.ge.s32.totalorder %s735_s12, 2  ;;  %s501_s26 = sand.u32 1, %s723_s9  }
  0xf6   : > { %s502_s27 = scalar_lea.sflag [#allocation3], %s501_s26 }
  0xf7   : > { %p573_p2 = pnand %p576_p1, %p792_p6 }
  0xf9   : > { %718 = dma.done.wait (!%p573_p2), %s502_s27, 16  }
  0xfa   : > { %720 = vsyncadd (!%p573_p2), %s502_s27, 4294967280  ;;  %p12_p3 = scmp.ge.s32.totalorder %s776_s15, 6   ;;  %s936_s9 = smov %s727_s10 }
  0xfb   : > { %s937_s10 = smov %s731_s11  ;;  %s938_s11 = smov %s786_s18 }
  0xfc   : > { %s939_s12 = smov %s776_s15  ;;  %14 = sbr.rel (!%p12_p3) target bundleno = 3 (0x3), region = 63 }
 0x103   :  { %506 = vsyncpa [#allocation3], 1 }
 0x104   :  { %508 = vsyncpa [#allocation3 + $0x1], 1 }

</bundles_post_ra>
